<compile_context>
chip_gen: v5e
topology: v5e:2x2
jax: 0.10.0
libtpu: 0.0.40
codegen_flags: <defaults>
</compile_context>

<pallas_src>
import jax
import jax.numpy as jnp
from jax import lax
from jax.experimental import pallas as pl
from jax.experimental.pallas import tpu as pltpu


def _tpu_generation_params():
    """(vmem_limit_bytes, l_tile_target) chosen from this chip's VMEM size.

    v5e/v6e have 128 MiB of VMEM per core -> larger L tiles and a higher
    scoped-VMEM limit; v7x has 64 MiB -> ~48 MiB limit and TL target 512.
    Falls back to the conservative (v7x-sized) settings if the query is
    unavailable in this JAX version.
    """
    try:
        vmem_cap = pltpu.get_tpu_info().vmem_capacity_bytes
    except Exception:
        vmem_cap = 64 * 1024 * 1024
    if vmem_cap >= 100 * 1024 * 1024:        # v5e / v6e (128 MiB)
        return 96 * 1024 * 1024, 1024
    return 48 * 1024 * 1024, 512             # v7x (64 MiB physical)


def _pick_l_tile(L, target):
    """Return (TL, L_pad): an L tile and the padded length it evenly divides.

    TL is L itself when L <= target, otherwise a multiple-of-8 divisor of L
    near `target`.  If no reasonable divisor exists, TL = target (rounded down
    to a multiple of 8) and L is zero-padded up to the next multiple of TL
    (tail sliced off after the kernel) -- never a silent full-L block.
    """
    if L <= target:
        return L, L
    t = (target // 8) * 8
    floor = max(8, t // 4)
    tt = t
    while tt >= floor:
        if L % tt == 0:
            return tt, L
        tt -= 8
    l_pad = ((L + t - 1) // t) * t
    return t, l_pad


def _upsample_conv1d_kernel(x_ref, halo_ref, w_ref, b_ref, out_ref):
    # x_ref:    (1, TL, C)      channel-last tile of the input
    # halo_ref: (1, 1, 2, C)    row 0: x[t*TL - 1], row 1: x[(t+1)*TL]
    #                           (zeros at the global edges)
    # w_ref:    (2, 2C, C)      [0] = vstack([W0, W1+W2]) (even taps)
    #                           [1] = vstack([W0+W1, W2]) (odd taps)
    # b_ref:    (1, C)          f32 bias
    # out_ref:  (1, TL, 2C)     even rows -> [:, :C], odd rows -> [:, C:]
    x = x_ref[0]                                   # (TL, C)
    TL, C = x.shape

    halo = halo_ref[0, 0]                          # (2, C)
    prev_row = halo[0:1, :]                        # (1, C) == x[t*TL - 1]
    next_row = halo[1:2, :]                        # (1, C) == x[(t+1)*TL]

    row = lax.broadcasted_iota(jnp.int32, (TL, 1), 0)
    # x[i-1] / x[i+1] within the tile; the boundary rows come from the halo.
    # pltpu.roll needs a non-negative shift, so -1 == TL-1.
    x_prev = jnp.where(row == 0, prev_row, pltpu.roll(x, shift=1, axis=0))
    x_next = jnp.where(row == TL - 1, next_row, pltpu.roll(x, shift=TL - 1, axis=0))

    b = b_ref[...]                                 # (1, C) f32, broadcasts over TL

    even = jnp.dot(jnp.concatenate([x_prev, x], axis=-1), w_ref[0],
                   preferred_element_type=jnp.float32) + b
    odd = jnp.dot(jnp.concatenate([x, x_next], axis=-1), w_ref[1],
                  preferred_element_type=jnp.float32) + b

    # Lane-contiguous interleaved store into the (TL, 2C) block.
    out_ref[0, :, :C] = even.astype(out_ref.dtype)
    out_ref[0, :, C:] = odd.astype(out_ref.dtype)


def upsample_forward_nlc(x_nlc, weight, bias, *, compute_dtype=None,
                         l_tile_target=None):
    """Channel-last entry point (no transposes).
    x_nlc: (B, L, C).  weight: (C_out, C_in, 3) with C_out == C_in == C.
    bias: (C_out,).  Returns (B, 2L, C_out) in `compute_dtype` (default: x dtype).
    """
    B, L, C = x_nlc.shape
    dt = jnp.dtype(compute_dtype) if compute_dtype is not None else x_nlc.dtype

    vmem_limit, default_tl = _tpu_generation_params()
    if l_tile_target is None:
        l_tile_target = default_tl

    TL, L_pad = _pick_l_tile(L, l_tile_target)
    Tn = L_pad // TL

    x_c = x_nlc.astype(dt)
    if L_pad != L:
        x_c = jnp.pad(x_c, ((0, 0), (0, L_pad - L), (0, 0)))

    # Per-tap weights in (C_in, C_out) layout, fused into two K=2C matrices.
    w0 = weight[:, :, 0].T
    w1 = weight[:, :, 1].T
    w2 = weight[:, :, 2].T
    w_even = jnp.concatenate([w0, w1 + w2], axis=0)        # (2C, C) for [x_prev|x]
    w_odd = jnp.concatenate([w0 + w1, w2], axis=0)         # (2C, C) for [x|x_next]
    w_stack = jnp.stack([w_even, w_odd], axis=0).astype(dt)  # (2, 2C, C)
    b2d = bias[None, :].astype(jnp.float32)                 # (1, C) f32

    # Merged halo side-input: [prev_row, next_row] per (batch, tile).
    last_rows = x_c[:, TL - 1::TL, :]                       # (B, Tn, C)
    first_rows = x_c[:, ::TL, :]                            # (B, Tn, C)
    zrow = jnp.zeros((B, 1, C), dt)
    prev_edge = jnp.concatenate([zrow, last_rows[:, :Tn - 1, :]], axis=1)
    next_edge = jnp.concatenate([first_rows[:, 1:, :], zrow], axis=1)
    halo = jnp.stack([prev_edge, next_edge], axis=2)        # (B, Tn, 2, C)

    out = pl.pallas_call(
        _upsample_conv1d_kernel,
        out_shape=jax.ShapeDtypeStruct((B, L_pad, 2 * C), dt),
        grid_spec=pltpu.PrefetchScalarGridSpec(
            num_scalar_prefetch=0,
            grid=(B, Tn),
            in_specs=[
                pl.BlockSpec((1, TL, C), lambda b, t: (b, t, 0)),       # x tile
                pl.BlockSpec((1, 1, 2, C), lambda b, t: (b, t, 0, 0)),  # halo rows
                pl.BlockSpec((2, 2 * C, C), lambda b, t: (0, 0, 0)),    # fused weights
                pl.BlockSpec((1, C), lambda b, t: (0, 0)),              # bias (f32)
            ],
            out_specs=pl.BlockSpec((1, TL, 2 * C), lambda b, t: (b, t, 0)),
        ),
        compiler_params=pltpu.CompilerParams(
            dimension_semantics=("parallel", "parallel"),
            vmem_limit_bytes=vmem_limit),
    )(x_c, halo, w_stack, b2d)

    # (B, L_pad, 2C) -> (B, 2*L_pad, C): row-major contiguous, metadata-only.
    out = out.reshape(B, 2 * L_pad, C)
    if L_pad != L:
        out = out[:, :2 * L, :]
    return out


def upsample_forward(x_ncl, weight, bias, *, compute_dtype=None,
                     l_tile_target=None):
    """NCL interface matching the PyTorch module: (B, C, L) -> (B, C, 2L).
    The two transposes exist only to honor the NCL interface (each is a full
    HBM pass); a channel-last model should call upsample_forward_nlc directly.
    """
    x = jnp.transpose(x_ncl, (0, 2, 1))            # (B, L, C)
    out = upsample_forward_nlc(x, weight, bias, compute_dtype=compute_dtype,
                               l_tile_target=l_tile_target)
    return jnp.transpose(out, (0, 2, 1))           # (B, C, 2L)


def _reference_forward(x_ncl, weight, bias):
    """Pure-JAX reference: nearest upsample x2 + Conv1d(k=3, pad=1)."""
    up = jnp.repeat(x_ncl, 2, axis=2)              # nearest, scale_factor=2
    out = lax.conv_general_dilated(
        up, weight, window_strides=(1,), padding=((1, 1),),
        dimension_numbers=("NCH", "OIH", "NCH"))
    return out + bias[None, :, None]


def _make_params(key, C):
    k_w, k_b = jax.random.split(key)
    fan_in = C * 3
    bound = 1.0 / (fan_in ** 0.5)
    weight = jax.random.uniform(k_w, (C, C, 3), jnp.float32, -bound, bound)
    bias = jax.random.uniform(k_b, (C,), jnp.float32, -bound, bound)
    return weight, bias


if __name__ == "__main__":
    key = jax.random.PRNGKey(0)
    k1, k2, k3, kp1, kp2, kp3 = jax.random.split(key, 6)

    # --- Test 1: tiny f32 case (module-sized shapes), single tile ----------
    B, C, L = 2, 4, 16
    x = jax.random.normal(k1, (B, C, L), dtype=jnp.float32)
    weight, bias = _make_params(kp1, C)
    out = jax.block_until_ready(upsample_forward(x, weight, bias))
    ref = jax.block_until_ready(_reference_forward(x, weight, bias))
    assert out.shape == (B, C, 2 * L), out.shape
    assert jnp.allclose(out, ref, rtol=1e-4, atol=1e-4), float(
        jnp.max(jnp.abs(out - ref)))

    # --- Test 2: bf16 compute, C multiple of 128, tiled/halo path ----------
    B, C, L = 2, 128, 1024
    x = jax.random.normal(k2, (B, C, L), dtype=jnp.float32)
    weight, bias = _make_params(kp2, C)
    out = jax.block_until_ready(
        upsample_forward(x, weight, bias, compute_dtype=jnp.bfloat16,
                         l_tile_target=256))
    xq = x.astype(jnp.bfloat16).astype(jnp.float32)
    wq = weight.astype(jnp.bfloat16).astype(jnp.float32)
    ref = jax.block_until_ready(_reference_forward(xq, wq, bias))
    assert out.shape == (B, C, 2 * L), out.shape
    assert jnp.allclose(out.astype(jnp.float32), ref, rtol=2e-2, atol=2e-2), float(
        jnp.max(jnp.abs(out.astype(jnp.float32) - ref)))

    # --- Test 3: f32, awkward L (no good divisor) -> padded-tile path ------
    B, C, L = 1, 128, 328
    x = jax.random.normal(k3, (B, C, L), dtype=jnp.float32)
    weight, bias = _make_params(kp3, C)
    out = jax.block_until_ready(
        upsample_forward(x, weight, bias, l_tile_target=128))
    ref = jax.block_until_ready(_reference_forward(x, weight, bias))
    assert out.shape == (B, C, 2 * L), out.shape
    assert jnp.allclose(out, ref, rtol=1e-4, atol=1e-4), float(
        jnp.max(jnp.abs(out - ref)))

    print("KERNEL_OK")
</pallas_src>

<mosaic_0001>
module attributes {stable_mosaic.version = 11 : i64} {
  func.func @_upsample_conv1d_kernel(%arg0: i32, %arg1: i32, %arg2: memref<1x16x4xf32, #tpu.memory_space<vmem>>, %arg3: memref<1x1x2x4xf32, #tpu.memory_space<vmem>>, %arg4: memref<2x8x4xf32, #tpu.memory_space<vmem>>, %arg5: memref<1x4xf32, #tpu.memory_space<vmem>>, %arg6: memref<1x16x8xf32, #tpu.memory_space<vmem>>) attributes {dimension_semantics = [#tpu.dimension_semantics<parallel>, #tpu.dimension_semantics<parallel>], iteration_bounds = array<i64: 2, 1>, scalar_prefetch = 0 : i64, scratch_operands = 0 : i64, tpu.core_type = #tpu.core_type<tc>, window_params = [{transform_indices = @transform_0, window_bounds = array<i64: 1, 16, 4>}, {transform_indices = @transform_1, window_bounds = array<i64: 1, 1, 2, 4>}, {pipeline_mode = #tpu.pipeline_mode<synchronous>, transform_indices = @transform_2, window_bounds = array<i64: 2, 8, 4>}, {pipeline_mode = #tpu.pipeline_mode<synchronous>, transform_indices = @transform_3, window_bounds = array<i64: 1, 4>}, {transform_indices = @transform_4, window_bounds = array<i64: 1, 16, 8>}]} {
    %c0 = arith.constant 0 : index
    %c0_0 = arith.constant 0 : index
    %c0_1 = arith.constant 0 : index
    %0 = vector.load %arg2[%c0, %c0_0, %c0_1] : memref<1x16x4xf32, #tpu.memory_space<vmem>>, vector<1x16x4xf32>
    %1 = vector.shape_cast %0 : vector<1x16x4xf32> to vector<16x4xf32>
    %c0_2 = arith.constant 0 : index
    %c0_3 = arith.constant 0 : index
    %c0_4 = arith.constant 0 : index
    %c0_5 = arith.constant 0 : index
    %2 = vector.load %arg3[%c0_2, %c0_3, %c0_4, %c0_5] : memref<1x1x2x4xf32, #tpu.memory_space<vmem>>, vector<1x1x2x4xf32>
    %3 = vector.shape_cast %2 : vector<1x1x2x4xf32> to vector<2x4xf32>
    %4 = vector.extract_strided_slice %3 {offsets = [0, 0], sizes = [1, 4], strides = [1, 1]} : vector<2x4xf32> to vector<1x4xf32>
    %5 = vector.extract_strided_slice %3 {offsets = [1, 0], sizes = [1, 4], strides = [1, 1]} : vector<2x4xf32> to vector<1x4xf32>
    %6 = tpu.iota {dimensions = array<i32: 0>} : vector<16x1xi32>
    %c0_i32 = arith.constant 0 : i32
    %7 = vector.broadcast %c0_i32 : i32 to vector<16x1xi32>
    %8 = arith.cmpi eq, %6, %7 : vector<16x1xi32>
    %c1_i32 = arith.constant 1 : i32
    %9 = tpu.dynamic_rotate %1 by %c1_i32 dim 0 : vector<16x4xf32>, i32 -> vector<16x4xf32>
    %10 = vector.shape_cast %8 : vector<16x1xi1> to vector<16x1xi1>
    %11 = vector.broadcast %10 : vector<16x1xi1> to vector<16x4xi1>
    %12 = vector.shape_cast %4 : vector<1x4xf32> to vector<1x4xf32>
    %13 = vector.broadcast %12 : vector<1x4xf32> to vector<16x4xf32>
    %14 = arith.select %11, %13, %9 : vector<16x4xi1>, vector<16x4xf32>
    %c15_i32 = arith.constant 15 : i32
    %15 = vector.broadcast %c15_i32 : i32 to vector<16x1xi32>
    %16 = arith.cmpi eq, %6, %15 : vector<16x1xi32>
    %c15_i32_6 = arith.constant 15 : i32
    %17 = tpu.dynamic_rotate %1 by %c15_i32_6 dim 0 : vector<16x4xf32>, i32 -> vector<16x4xf32>
    %18 = vector.shape_cast %16 : vector<16x1xi1> to vector<16x1xi1>
    %19 = vector.broadcast %18 : vector<16x1xi1> to vector<16x4xi1>
    %20 = vector.shape_cast %5 : vector<1x4xf32> to vector<1x4xf32>
    %21 = vector.broadcast %20 : vector<1x4xf32> to vector<16x4xf32>
    %22 = arith.select %19, %21, %17 : vector<16x4xi1>, vector<16x4xf32>
    %c0_7 = arith.constant 0 : index
    %c0_8 = arith.constant 0 : index
    %23 = vector.load %arg5[%c0_7, %c0_8] : memref<1x4xf32, #tpu.memory_space<vmem>>, vector<1x4xf32>
    %24 = tpu.concatenate %14, %1 in 1 : vector<16x4xf32>, vector<16x4xf32> -> vector<16x8xf32>
    %c0_9 = arith.constant 0 : index
    %c0_10 = arith.constant 0 : index
    %c0_11 = arith.constant 0 : index
    %25 = vector.load %arg4[%c0_9, %c0_10, %c0_11] : memref<2x8x4xf32, #tpu.memory_space<vmem>>, vector<1x8x4xf32>
    %26 = vector.shape_cast %25 : vector<1x8x4xf32> to vector<8x4xf32>
    %cst = arith.constant dense<0.000000e+00> : vector<16x4xf32>
    %27 = tpu.matmul %24, %26, %cst {dimension_numbers = #tpu.dot_dimension_numbers<[1], [0], [0], [1], [0, 0, 1, 1], [], []>} : vector<16x8xf32>, vector<8x4xf32>, vector<16x4xf32> -> vector<16x4xf32>
    %28 = vector.broadcast %23 : vector<1x4xf32> to vector<16x4xf32>
    %29 = arith.addf %27, %28 : vector<16x4xf32>
    %30 = tpu.concatenate %1, %22 in 1 : vector<16x4xf32>, vector<16x4xf32> -> vector<16x8xf32>
    %c1 = arith.constant 1 : index
    %c0_12 = arith.constant 0 : index
    %c0_13 = arith.constant 0 : index
    %31 = vector.load %arg4[%c1, %c0_12, %c0_13] : memref<2x8x4xf32, #tpu.memory_space<vmem>>, vector<1x8x4xf32>
    %32 = vector.shape_cast %31 : vector<1x8x4xf32> to vector<8x4xf32>
    %cst_14 = arith.constant dense<0.000000e+00> : vector<16x4xf32>
    %33 = tpu.matmul %30, %32, %cst_14 {dimension_numbers = #tpu.dot_dimension_numbers<[1], [0], [0], [1], [0, 0, 1, 1], [], []>} : vector<16x8xf32>, vector<8x4xf32>, vector<16x4xf32> -> vector<16x4xf32>
    %34 = vector.broadcast %23 : vector<1x4xf32> to vector<16x4xf32>
    %35 = arith.addf %33, %34 : vector<16x4xf32>
    %c0_15 = arith.constant 0 : index
    %c0_16 = arith.constant 0 : index
    %c0_17 = arith.constant 0 : index
    %36 = vector.load %arg6[%c0_15, %c0_16, %c0_17] : memref<1x16x8xf32, #tpu.memory_space<vmem>>, vector<1x16x4xf32>
    %37 = vector.shape_cast %36 : vector<1x16x4xf32> to vector<16x4xf32>
    %38 = vector.shape_cast %29 : vector<16x4xf32> to vector<1x16x4xf32>
    tpu.vector_store %arg6[%c0_15, %c0_16, %c0_17], %38 {strides = array<i32>} : memref<1x16x8xf32, #tpu.memory_space<vmem>>, vector<1x16x4xf32>,
    %c0_18 = arith.constant 0 : index
    %c0_19 = arith.constant 0 : index
    %c4 = arith.constant 4 : index
    %39 = vector.load %arg6[%c0_18, %c0_19, %c4] : memref<1x16x8xf32, #tpu.memory_space<vmem>>, vector<1x16x4xf32>
    %40 = vector.shape_cast %39 : vector<1x16x4xf32> to vector<16x4xf32>
    %41 = vector.shape_cast %35 : vector<16x4xf32> to vector<1x16x4xf32>
    tpu.vector_store %arg6[%c0_18, %c0_19, %c4], %41 {strides = array<i32>} : memref<1x16x8xf32, #tpu.memory_space<vmem>>, vector<1x16x4xf32>,
    return
  }
  func.func @transform_0(%arg0: i32, %arg1: i32) -> (i32, i32, i32) {
    %c0_i32 = arith.constant 0 : i32
    %c0_i32_0 = arith.constant 0 : i32
    return %arg0, %arg1, %c0_i32 : i32, i32, i32
  }
  func.func @transform_1(%arg0: i32, %arg1: i32) -> (i32, i32, i32, i32) {
    %c0_i32 = arith.constant 0 : i32
    %c0_i32_0 = arith.constant 0 : i32
    %c0_i32_1 = arith.constant 0 : i32
    return %arg0, %arg1, %c0_i32, %c0_i32_0 : i32, i32, i32, i32
  }
  func.func @transform_2(%arg0: i32, %arg1: i32) -> (i32, i32, i32) {
    %c0_i32 = arith.constant 0 : i32
    %c0_i32_0 = arith.constant 0 : i32
    %c0_i32_1 = arith.constant 0 : i32
    %c0_i32_2 = arith.constant 0 : i32
    return %c0_i32, %c0_i32_0, %c0_i32_1 : i32, i32, i32
  }
  func.func @transform_3(%arg0: i32, %arg1: i32) -> (i32, i32) {
    %c0_i32 = arith.constant 0 : i32
    %c0_i32_0 = arith.constant 0 : i32
    %c0_i32_1 = arith.constant 0 : i32
    return %c0_i32, %c0_i32_0 : i32, i32
  }
  func.func @transform_4(%arg0: i32, %arg1: i32) -> (i32, i32, i32) {
    %c0_i32 = arith.constant 0 : i32
    %c0_i32_0 = arith.constant 0 : i32
    return %arg0, %arg1, %c0_i32 : i32, i32, i32
  }
}

</mosaic_0001>

<bundles_post_ra>
// kernel: tpu_custom_call.1
= control target key start
LH: loop header
LB: loop body
LE: loop exit
PB: predicated region body
PF: predicated region fallthrough
CT: control target
= control target key end

     0   :  { %s598_s15 = smov 0   ;;  %s600_s16 = smov 0   ;;  %s663_s0 = inlined_call_operand.vmem [shape: f32[2,16,4], index: 0, kind: input, shape index: {}]   ;;  %s664_s1 = inlined_call_operand.vmem [shape: f32[2,1,2,4], index: 1, kind: input, shape index: {}]   ;;  %s665_s2 = inlined_call_operand.vmem [shape: f32[2,8,4], index: 2, kind: input, shape index: {}]   ;;  %s666_s3 = inlined_call_operand.vmem [shape: f32[1,4], index: 3, kind: input, shape index: {}]   ;;  %s667_s4 = inlined_call_operand.vmem [shape: f32[2,16,8], index: 4, kind: output, shape index: {}]  }
   0x1   :  { %s602_s17 = smov 0  }
   0x2 LB: > { %s26_s18 = sadd.s32 1, %s566_s16  ;;  %p505_p0 = scmp.ge.s32.totalorder %s570_s17, 1  ;;  %s570_s17 = sphi %s602_s17, %s14_s17   ;;  %s566_s16 = sphi %s600_s16, %s669_s16   ;;  %s562_s15 = sphi %s598_s15, %s668_s15  }
   0x3   : > { %p28_p1 = scmp.ge.s32.totalorder %s26_s18, 2  ;;  %p197_p2 = scmp.lt.s32.totalorder %s570_s17, 3 }
   0x5   : > { %s671_s18 = smov (%p28_p1, %s26_s18), 0  ;;  %p198_p3 = pnand %p505_p0, %p197_p2 }
   0x6   : > { %p239_p4 = scmp.lt.s32.totalorder (!%p198_p3), %s562_s15, 1  ;;  %s572_s27 = smov (!%p198_p3), 4  }
   0x7   : > { %201 = sbr.rel (%p198_p3) target bundleno = 372 (0x174), region = 36 }
   0xc   : > { %v268_v0 = vlaneseq  ;;  %s673_s15 = smov (!%p239_p4, %s562_s15), 1  ;;  %v513_v12 = vld [vmem:[%s665_s2 + $0x8] sm:$0xff]  ;;  %v311_v13 = vld [vmem:[%s665_s2] sm:$0xff]  ;;  %vm308_vm3 = vcmask 31744   ;;  %vm315_vm4 = vcmask 64512   ;;  %vm396_vm6 = vcmask 64544  }
   0xd   : > { %s518_s19 = sshll.u32 %s673_s15, 4  ;;  %s508_s20 = sshll.u32 %s673_s15, 1  ;;  %521 = vmatpush.msra.mxu3 %v513_v12  ;;  %378 = vmatpush.msra.mxu1 %v513_v12  ;;  %v547_v28 = vld [vmem:[%s666_s3] ss:$0 sm:$0xff] }
   0xe   : > { %v269_v1 = vshrl.u32 %v268_v0, 7  ;;  %s246_s23 = scalar_lea.vmem %s663_s0, %s518_s19  ;;  %s254_s26 = scalar_lea.vmem %s664_s1, %s508_s20  ;;  %337 = vmatpush.msra.mxu0 %v311_v13  ;;  %520 = vmatpush.msra.mxu2 %v311_v13 }
   0xf   : > { %v265_v3 = vld [vmem:[%s246_s23] sm:$0xff]  ;;  %v266_v4 = vld [vmem:[%s246_s23 + $0x8] sm:$0xff]  ;;  %s263_s10 = scalar_lea.vmem %s667_s4, %s518_s19 }
  0x10   : > { %v270_v2 = vadd.s32 8, %v269_v1  ;;  %v267_v5 = vld [vmem:[%s254_s26] sm:$0x3]  ;;  %vm289_vm0 = vcmp.lt.s32.totalorder %v269_v1, 7  ;;  %v287_v6 = vrot.slane %v265_v3, 1  ;;  %v288_v7 = vrot.slane %v266_v4, 1  ;;  %304 = vrot.lane.b32.xlu1 %v266_v4, %s572_s27 }
  0x11   : > { %v296_v8 = vperm.slane %v267_v5, 1  ;;  %v273_v14 = vrot.slane %v265_v3, 7  ;;  %v274_v15 = vrot.slane %v266_v4, 7  ;;  %vm275_vm2 = vcmp.lt.s32.totalorder %v269_v1, 1 }
  0x12   : > { %vm286_vm1 = vcmp.eq.s32.totalorder %v270_v2, 15  ;;  %v291_v9 = vsel %vm289_vm0, %v288_v7, %v287_v6  ;;  %v290_v11 = vsel %vm289_vm0, %v287_v6, %v288_v7  ;;  %v282_v19 = vperm.slane %v267_v5, 0 }
  0x13   : > { %v298_v10 = vsel %vm286_vm1, %v296_v8, %v291_v9  ;;  %v276_v16 = vsel %vm275_vm2, %v273_v14, %v274_v15  ;;  %vm271_vm5 = vcmp.eq.s32.totalorder %v269_v1, 0  ;;  %v277_v20 = vsel %vm275_vm2, %v274_v15, %v273_v14 }
  0x14   : > { %349 = vrot.lane.b32.xlu0 %v298_v10, %s572_s27  ;;  %v283_v23 = vsel %vm271_vm5, %v282_v19, %v277_v20 }
  0x18   : > { %302 = vrot.lane.b32.xlu1 %v265_v3, %s572_s27 }
  0x1c   : > { %347 = vrot.lane.b32.xlu0 %v290_v11, %s572_s27 }
  0x82   : > { %v305_v17 = vpop.permute.xlu1 %304 }
  0x83   : > { %v310_v18 = vsel %vm308_vm3, %v276_v16, %v305_v17 }
  0x84   : > { %512 = vmatmul.msk.f32.vlgmr.msra.gmra.mxu2 %vm315_vm4, %v310_v18 }
  0x86   : > { %v350_v21 = vpop.permute.xlu0 %349 }
  0x87   : > { %v354_v22 = vsel %vm308_vm3, %v266_v4, %v350_v21 }
  0x88   : > { %515 = vmatmul.msk.f32.vlgmr.msra.gmra.mxu3 %vm315_vm4, %v354_v22 }
  0x8a   : > { %v303_v24 = vpop.permute.xlu1 %302 }
  0x8b   : > { %v309_v25 = vsel %vm308_vm3, %v283_v23, %v303_v24 }
  0x8c   : > { %511 = vmatmul.msk.f32.vlgmr.msra.gmra.mxu0 %vm315_vm4, %v309_v25 }
  0x8e   : > { %v348_v26 = vpop.permute.xlu0 %347 }
  0x8f   : > { %v353_v27 = vsel %vm308_vm3, %v265_v3, %v348_v26 }
  0x90   : > { %514 = vmatmul.msk.f32.vlgmr.msra.gmra.mxu1 %vm315_vm4, %v353_v27 }
 0x107   : > { %v342_v35 = vpop.f32.mrf.mxu2 }
 0x108   : > { %v343_v36 = vadd.f32 %v547_v28, %v342_v35 }
 0x109   : > { %v339_v29 = vpop.f32.mrf.mxu0 }
 0x10a   : > { %v340_v30 = vadd.f32 %v547_v28, %v339_v29  ;;  %387 = vst.msk [vmem:[%s263_s10 + $0x8] sm:$0xff] %vm308_vm3, %v343_v36 }
 0x10b   : > { %v383_v33 = vpop.f32.mrf.mxu3 }
 0x10c   : > { %386 = vst.msk [vmem:[%s263_s10] sm:$0xff] %vm308_vm3, %v340_v30  ;;  %v384_v34 = vadd.f32 %v547_v28, %v383_v33 }
 0x10d   : > { %v380_v31 = vpop.f32.mrf.mxu1 }
 0x10e   : > { %v381_v32 = vadd.f32 %v547_v28, %v380_v31 }
 0x110   : > { %390 = vrot.lane.b32.xlu2 %v381_v32, %s572_s27 }
 0x118   : > { %392 = vrot.lane.b32.xlu2 %v384_v34, %s572_s27 }
 0x16a   : > { %v391_v37 = vpop.permute.xlu2 %390 }
 0x16b   : > { %397 = vst.msk [vmem:[%s263_s10] sm:$0xff] %vm396_vm6, %v391_v37 }
 0x172   : > { %v393_v38 = vpop.permute.xlu2 %392 }
 0x173   : > { %398 = vst.msk [vmem:[%s263_s10 + $0x8] sm:$0xff] %vm396_vm6, %v393_v38 }
 0x174 PF: > { %s14_s17 = sadd.s32 1, %s570_s17   ;;  %s668_s15 = smov %s566_s16 }
 0x175   : > { %p11_p5 = scmp.ge.s32.totalorder %s14_s17, 4   ;;  %s669_s16 = smov %s671_s18 }
 0x177   :  { %13 = sbr.rel (!%p11_p5) target bundleno = 2 (0x2), region = 70 }

</bundles_post_ra>
